<compile_context>
chip_gen: v7x
topology: tpu7x:2x2x1
jax: 0.10.0
libtpu: 0.0.40
codegen_flags: <defaults>
</compile_context>

<pallas_src>
import jax
import jax.numpy as jnp
from jax.experimental import pallas as pl
from jax.experimental.pallas import tpu as pltpu

LANE = 128
TARGET_BLOCK_BYTES = 2 << 20  # 2 MiB per block buffer (x2 arrays x2 bufs ~= 8 MiB VMEM)


def _round_up(a, b):
    return ((a + b - 1) // b) * b


def _is_multi_tensorcore_chip():
    """Best-effort detection of 2-TensorCore parts (v7x); default False."""
    try:
        kind = jax.devices()[0].device_kind.lower()
    except Exception:
        return False
    return ("v7" in kind) or ("v4" in kind) or ("v3" in kind)


def _mish_kernel(x_ref, o_ref):
    x = x_ref[...].astype(jnp.float32)
    # mish(x) = x * tanh(softplus(x)) = x - 2x / ((1 + e^x)^2 + 1)
    # Clamp the exp argument so (1+t)^2 stays finite; for x >= 30 mish(x) == x
    # to f32 precision and the correction term is ~1e-24 * x.  The clamp also
    # keeps the (masked, never-written) ragged-tail rows free of Inf overflow.
    t = jnp.exp(jnp.minimum(x, 30.0))                 # EUP op #1
    u = 1.0 + t
    den = u * u + 1.0
    r = pl.reciprocal(den, approx=True)               # EUP op #2 (~12-bit)
    r = r * (2.0 - den * r)                           # one Newton step -> ~f32 accuracy
    y = x - (2.0 * x) * r
    o_ref[...] = y.astype(o_ref.dtype)


def mish(x):
    """Elementwise Mish(x) = x * tanh(softplus(x)); any shape, float dtype."""
    orig_shape = x.shape
    orig_dtype = x.dtype

    n = 1
    for d in orig_shape:
        n *= d
    if n == 0:
        return x

    itemsize = jnp.dtype(orig_dtype).itemsize
    # Native sublane packing: 8 rows for 4-byte, 16 for 2-byte, 32 for 1-byte.
    pack = {4: 8, 2: 16, 1: 32}.get(itemsize, 8)

    # Pad only when the element count is not a multiple of the lane width;
    # raggedness along the (blocked) row axis is handled by pallas_call.
    flat = x.reshape(-1)
    n_pad = _round_up(n, LANE)
    padded = n_pad != n
    if padded:
        flat = jnp.pad(flat, (0, n_pad - n))

    x2d = flat.reshape(-1, LANE)
    rows = x2d.shape[0]

    # ~2 MiB blocks (multiple of the native sublane pack).
    max_block_rows = max(pack, (TARGET_BLOCK_BYTES // (LANE * itemsize)) // pack * pack)
    if _is_multi_tensorcore_chip():
        # Keep grid >= 2 so both TensorCores get work on v7x.
        cap = _round_up(pl.cdiv(rows, 2), pack)
    else:
        # Single-TC chip: one maximal block, no extra grid-step overhead.
        cap = _round_up(rows, pack)
    block_rows = max(pack, min(max_block_rows, cap))
    grid = (pl.cdiv(rows, block_rows),)

    out2d = pl.pallas_call(
        _mish_kernel,
        out_shape=jax.ShapeDtypeStruct((rows, LANE), orig_dtype),
        grid=grid,
        in_specs=[pl.BlockSpec((block_rows, LANE), lambda i: (i, 0))],
        out_specs=pl.BlockSpec((block_rows, LANE), lambda i: (i, 0)),
        compiler_params=pltpu.CompilerParams(
            # "parallel" shards the streaming axis across TCs on 2-TC parts.
            # TODO(synk): if xprof shows a single busy TC on v7x, switch this
            # axis to pltpu.CORE_PARALLEL.
            dimension_semantics=("parallel",),
        ),
        cost_estimate=pl.CostEstimate(
            flops=9 * n,
            transcendentals=2 * n,
            bytes_accessed=2 * n * itemsize,
        ),
    )(x2d)

    if padded:
        return out2d.reshape(-1)[:n].reshape(orig_shape)
    return out2d.reshape(orig_shape)


def _mish_reference(x):
    xf = x.astype(jnp.float32)
    return (xf * jnp.tanh(jax.nn.softplus(xf))).astype(x.dtype)


if __name__ == "__main__":
    key = jax.random.PRNGKey(0)
    k1, k2, k3, k4, k5 = jax.random.split(key, 5)

    # Main case: NCHW activation, element count a multiple of 128 (zero-copy path).
    x = jax.random.normal(k1, (2, 4, 16, 16), dtype=jnp.float32) * 3.0
    y = mish(x)
    jax.block_until_ready(y)
    y_ref = _mish_reference(x)
    assert y.shape == x.shape and y.dtype == x.dtype
    assert jnp.allclose(y, y_ref, atol=2e-4, rtol=2e-4), "mismatch vs reference (f32)"

    # Ragged last block (rows not a multiple of block_rows / sublane pack).
    x2 = jax.random.normal(k2, (5, 4, 16, 16), dtype=jnp.float32) * 3.0
    y2 = mish(x2)
    assert jnp.allclose(y2, _mish_reference(x2), atol=2e-4, rtol=2e-4), "mismatch (ragged)"

    # n % 128 == 0 but not a multiple of 1024: now zero-copy, ragged row tail.
    x5 = jax.random.normal(k5, (1, 1, 8, 48), dtype=jnp.float32) * 3.0
    y5 = mish(x5)
    assert jnp.allclose(y5, _mish_reference(x5), atol=2e-4, rtol=2e-4), "mismatch (128-mult)"

    # Padding path (element count not a multiple of 128).
    x3 = jax.random.normal(k3, (1, 3, 5, 7), dtype=jnp.float32) * 3.0
    y3 = mish(x3)
    assert jnp.allclose(y3, _mish_reference(x3), atol=2e-4, rtol=2e-4), "mismatch (padded)"

    # bf16 inputs (halved HBM traffic; internal compute stays f32).
    x4 = (jax.random.normal(k4, (2, 4, 16, 16), dtype=jnp.float32) * 3.0).astype(jnp.bfloat16)
    y4 = mish(x4)
    assert y4.dtype == jnp.bfloat16
    assert jnp.allclose(
        y4.astype(jnp.float32),
        _mish_reference(x4).astype(jnp.float32),
        atol=3e-2, rtol=3e-2,
    ), "mismatch (bf16)"

    jax.block_until_ready((y, y2, y3, y4, y5))
    print("KERNEL_OK")
</pallas_src>

<mosaic_0001>
module attributes {stable_mosaic.version = 11 : i64} {
  func.func @_mish_kernel(%arg0: i32, %arg1: memref<16x128xf32, #tpu.memory_space<vmem>>, %arg2: memref<16x128xf32, #tpu.memory_space<vmem>>) attributes {dimension_semantics = [#tpu.dimension_semantics<parallel>], iteration_bounds = array<i64: 1>, scalar_prefetch = 0 : i64, scratch_operands = 0 : i64, tpu.core_type = #tpu.core_type<tc>, window_params = [{transform_indices = @transform_0, window_bounds = array<i64: 16, 128>}, {transform_indices = @transform_1, window_bounds = array<i64: 16, 128>}]} {
    %c0 = arith.constant 0 : index
    %c0_0 = arith.constant 0 : index
    %0 = vector.load %arg1[%c0, %c0_0] : memref<16x128xf32, #tpu.memory_space<vmem>>, vector<16x128xf32>
    %cst = arith.constant 3.000000e+01 : f32
    %1 = vector.broadcast %cst : f32 to vector<16x128xf32>
    %2 = arith.minimumf %0, %1 : vector<16x128xf32>
    %3 = math.exp %2 : vector<16x128xf32>
    %cst_1 = arith.constant 1.000000e+00 : f32
    %4 = vector.broadcast %cst_1 : f32 to vector<16x128xf32>
    %5 = arith.addf %4, %3 : vector<16x128xf32>
    %6 = arith.mulf %5, %5 : vector<16x128xf32>
    %cst_2 = arith.constant 1.000000e+00 : f32
    %7 = vector.broadcast %cst_2 : f32 to vector<16x128xf32>
    %8 = arith.addf %6, %7 : vector<16x128xf32>
    %9 = tpu.reciprocal %8 {approx = true} : vector<16x128xf32> -> vector<16x128xf32>
    %10 = arith.mulf %8, %9 : vector<16x128xf32>
    %cst_3 = arith.constant 2.000000e+00 : f32
    %11 = vector.broadcast %cst_3 : f32 to vector<16x128xf32>
    %12 = arith.subf %11, %10 : vector<16x128xf32>
    %13 = arith.mulf %9, %12 : vector<16x128xf32>
    %cst_4 = arith.constant 2.000000e+00 : f32
    %14 = vector.broadcast %cst_4 : f32 to vector<16x128xf32>
    %15 = arith.mulf %14, %0 : vector<16x128xf32>
    %16 = arith.mulf %15, %13 : vector<16x128xf32>
    %17 = arith.subf %0, %16 : vector<16x128xf32>
    %c0_5 = arith.constant 0 : index
    %c0_6 = arith.constant 0 : index
    %18 = vector.load %arg2[%c0_5, %c0_6] : memref<16x128xf32, #tpu.memory_space<vmem>>, vector<16x128xf32>
    tpu.vector_store %arg2[%c0_5, %c0_6], %17 {strides = array<i32>} : memref<16x128xf32, #tpu.memory_space<vmem>>, vector<16x128xf32>,
    return
  }
  func.func @transform_0(%arg0: i32) -> (i32, i32) {
    %c0_i32 = arith.constant 0 : i32
    %c0_i32_0 = arith.constant 0 : i32
    return %arg0, %c0_i32 : i32, i32
  }
  func.func @transform_1(%arg0: i32) -> (i32, i32) {
    %c0_i32 = arith.constant 0 : i32
    %c0_i32_0 = arith.constant 0 : i32
    return %arg0, %c0_i32 : i32, i32
  }
}

</mosaic_0001>

<bundles_post_ra>
// kernel: tpu_custom_call.1
= control target key start
LH: loop header
LB: loop body
LE: loop exit
PB: predicated region body
PF: predicated region fallthrough
CT: control target
= control target key end

     0   :  { %6 = vsyncpa [#allocation3], 0  ;;  %s174_s0 = inlined_call_operand.hbm [shape: f32[16,128], index: 0, kind: input, shape index: {}]   ;;  %s175_s1 = inlined_call_operand.hbm [shape: f32[16,128], index: 1, kind: output, shape index: {}]  }
   0x1   :  { %7 = vsyncpa [#allocation4], 0  ;;  %s130_s6 = smov [#allocation2]   ;;  %s82_s10 = scalar_lea.hbm %s174_s0, 256 }
   0x2   :  { %s13_s7 = sshll.u32 %s130_s6, 4  ;;  %p83_p0 = scmp.ne.s32.totalorder %s174_s0, %s82_s10  ;;  %s14_s7 = int_to_ptr.vmem [resolvable:$true] %s13_s7 }
   0x3   :  { %p86_p1 = scmp.lt.u32.totalorder %s82_s10, %s174_s0 }
   0x5   :  { %p88_p2 = pnand %p86_p1, %p83_p0 }
   0x7   :  { %91 = shalt.err (!%p88_p2)
}
   0x8   :  { %s92_s15 = scalar_lea.vmem %s14_s7, 256  ;;  %p97_p4 = scmp.lt.s32.totalorder %s14_s7, %s14_s7 }
   0x9   :  { %p93_p3 = scmp.ne.s32.totalorder %s14_s7, %s92_s15  ;;  %p98_p5 = scmp.lt.s32.totalorder %s92_s15, %s92_s15 }
   0xb   :  { %p99_p6 = por %p98_p5, %p97_p4 }
   0xd   :  { %p100_p7 = pnand %p99_p6, %p93_p3 }
   0xf   :  { %103 = shalt.err (!%p100_p7)
}
  0x10   :  { %s131_s16 = smov 128   ;;  %s132_s17 = smov 8  }
  0x11   :  { %19 = dma.hbm_to_vmem [thread:$0]  %s174_s0, 256, %s14_s7, [#allocation3], %s131_s16, %s131_s16, %s132_s17  }
  0x12   :  { %126 = dma.done.wait [#allocation3], 256  }
  0x13   :  { %127 = vsyncadd [#allocation3], 4294967040  ;;  %v23_v0 = vld [vmem:[#allocation2] sm:$0xff]  ;;  %v24_v1 = vld [vmem:[#allocation2 + $0x8] sm:$0xff]  ;;  %s133_s0 = smov [#allocation5]  }
  0x14   :  { %v25_v2 = vmin.f32 %v23_v0, 30.0  ;;  %v26_v3 = vmin.f32 %v24_v1, 30.0  ;;  %v45_v19 = vmul.f32 2.0, %v23_v0  ;;  %v46_v21 = vmul.f32 2.0, %v24_v1  ;;  %s58_s20 = sshll.u32 %s133_s0, 4  ;;  %s59_s20 = int_to_ptr.vmem [resolvable:$true] %s58_s20 }
  0x15   :  { %s104_s21 = scalar_lea.vmem %s59_s20, 256  ;;  %p109_p9 = scmp.lt.s32.totalorder %s59_s20, %s59_s20 }
  0x16   :  { %v27_v4 = vmul.f32 1.442695, %v25_v2  ;;  %v29_v5 = vmul.f32 1.442695, %v26_v3  ;;  %p105_p8 = scmp.ne.s32.totalorder %s59_s20, %s104_s21  ;;  %p110_p10 = scmp.lt.s32.totalorder %s104_s21, %s104_s21 }
  0x18   :  { %74 = vpow2.f32 %v27_v4  ;;  %p111_p11 = por %p110_p10, %p109_p9 }
  0x19   :  { %76 = vpow2.f32 %v29_v5 }
  0x1a   :  { %p112_p12 = pnand %p111_p11, %p105_p8 }
  0x22   :  { %v75_v6 = vpop.eup %74 }
  0x23   :  { %v77_v7 = vpop.eup %76  ;;  %v31_v8 = vadd.f32 1.0, %v75_v6 }
  0x24   :  { %v32_v9 = vadd.f32 1.0, %v77_v7 }
  0x25   :  { %v33_v10 = vmul.f32 %v31_v8, %v31_v8 }
  0x26   :  { %v34_v11 = vmul.f32 %v32_v9, %v32_v9 }
  0x27   :  { %v35_v12 = vadd.f32 1.0, %v33_v10 }
  0x28   :  { %v36_v13 = vadd.f32 1.0, %v34_v11 }
  0x29   :  { %78 = vrcp.f32 %v35_v12 }
  0x2a   :  { %80 = vrcp.f32 %v36_v13 }
  0x33   :  { %v79_v14 = vpop.eup %78 }
  0x34   :  { %v81_v15 = vpop.eup %80  ;;  %v39_v16 = vmul.f32 %v79_v14, %v35_v12 }
  0x35   :  { %v40_v17 = vmul.f32 %v81_v15, %v36_v13 }
  0x36   :  { %v41_v18 = vsub.f32 2.0, %v39_v16 }
  0x37   :  { %v42_v20 = vsub.f32 2.0, %v40_v17 }
  0x38   :  { %v43_v22 = vmul.f32 %v79_v14, %v41_v18 }
  0x39   :  { %v44_v23 = vmul.f32 %v81_v15, %v42_v20 }
  0x3a   :  { %v47_v24 = vmul.f32 %v45_v19, %v43_v22 }
  0x3b   :  { %v48_v25 = vmul.f32 %v46_v21, %v44_v23 }
  0x3c   :  { %v49_v26 = vsub.f32 %v23_v0, %v47_v24 }
  0x3d   :  { %v50_v27 = vsub.f32 %v24_v1, %v48_v25 }
  0x3e   :  { %51 = vst [vmem:[#allocation5] sm:$0xff] %v49_v26 }
  0x3f   :  { %52 = vst [vmem:[#allocation5 + $0x8] sm:$0xff] %v50_v27 }
  0x40   :  { %115 = shalt.err (!%p112_p12)
}
  0x41   :  { %s116_s24 = scalar_lea.hbm %s175_s1, 256 }
  0x42   :  { %p117_p13 = scmp.ne.s32.totalorder %s175_s1, %s116_s24  ;;  %p120_p0 = scmp.lt.u32.totalorder %s116_s24, %s175_s1 }
  0x44   :  { %p122_p1 = pnand %p120_p0, %p117_p13 }
  0x46   :  { %125 = shalt.err (!%p122_p1)
}
  0x47   :  { %64 = dma.vmem_to_hbm [thread:$0]  %s59_s20, 256, %s175_s1, [#allocation4], %s131_s16, %s131_s16, %s132_s17  }
  0x48   :  { %128 = dma.done.wait [#allocation4], 256  }
  0x49   :  { %129 = vsyncadd [#allocation4], 4294967040 }
  0x4a   :  { %68 = vsyncpa [#allocation3], 1 }
  0x4b   :  { %69 = vsyncpa [#allocation4], 1 }

</bundles_post_ra>
